<compile_context>
chip_gen: v5e
topology: v5e:2x2
jax: 0.10.0
libtpu: 0.0.40
codegen_flags: <defaults>
</compile_context>

<pallas_src>
import functools

import jax
import jax.numpy as jnp
from jax import lax
from jax.experimental import pallas as pl
from jax.experimental.pallas import tpu as pltpu

EPS = 1e-12  # matches the PyTorch module's self.eps

_MAX_TILE_ROWS = 512       # ~85% of HBM roofline already at 512-row tiles
_TARGET_GRID_STEPS = 8     # >= 4 steps per TensorCore on v7x, >= 8 on v5e/v6e


def _sublane_packing(dtype) -> int:
    """Native sublane packing for the dtype (8 f32, 16 bf16, 32 int8/fp8)."""
    itemsize = jnp.dtype(dtype).itemsize
    return 8 * max(1, 4 // max(1, itemsize))


def _round_up(x: int, m: int) -> int:
    return ((x + m - 1) // m) * m


def _vmem_limits():
    """(vmem_limit_bytes, tile working-set budget) derived from the chip."""
    try:
        cap = int(pltpu.get_tpu_info().vmem_capacity_bytes)
    except Exception:
        cap = 64 * 1024 * 1024  # conservative (v7x per-TC VMEM)
    limit = max(32 * 1024 * 1024, min(64 * 1024 * 1024, cap // 2))
    budget = min(24 * 1024 * 1024, (3 * limit) // 4)
    return limit, budget


def _pick_tile_rows(rows: int, emb_dim_padded: int, dtype, budget: int) -> int:
    itemsize = jnp.dtype(dtype).itemsize
    packing = _sublane_packing(dtype)

    # Per-element resident footprint of one row-tile:
    #   2x double-buffered input + 2x double-buffered output (native dtype)
    #   + ~3 f32 temporaries (x_f32, diff, pre-downcast result).
    bytes_per_elem = 4 * itemsize + 3 * 4
    max_rows = budget // max(1, emb_dim_padded * bytes_per_elem)

    tile = min(max_rows, _MAX_TILE_ROWS)
    tile = max(packing, (tile // packing) * packing)
    tile = min(tile, _round_up(rows, packing))

    # Deepen the grid to >= _TARGET_GRID_STEPS when rows allow, but never
    # shrink below ~256 rows per tile just for depth (step overhead ~0.35us).
    depth_cap = max(packing, _round_up(pl.cdiv(rows, _TARGET_GRID_STEPS), packing))
    floor_rows = min(tile, 256)
    tile = max(floor_rows, min(tile, depth_cap))
    return tile


def _layernorm_kernel(x_ref, w_ref, b_ref, o_ref, *, emb_dim, needs_mask,
                      low_precision_affine):
    # x_ref: (tile_rows, emb_dim_padded); w_ref / b_ref: (1, emb_dim_padded)
    x = x_ref[...].astype(jnp.float32)
    inv_d = 1.0 / float(emb_dim)  # static; padded lanes are zero in HBM

    # Two-pass centered statistics (matches torch.var(unbiased=False) and
    # avoids E[x^2]-mean^2 cancellation on non-zero-mean data).
    mean = jnp.sum(x, axis=-1, keepdims=True) * inv_d
    diff = x - mean
    if needs_mask:
        lane = lax.broadcasted_iota(jnp.int32, (1, x.shape[-1]), 1)
        diff = jnp.where(lane < emb_dim, diff, 0.0)
    var = jnp.sum(diff * diff, axis=-1, keepdims=True) * inv_d
    inv = lax.rsqrt(var + EPS)  # EUP rsqrt

    w = w_ref[...]
    b = b_ref[...]
    if low_precision_affine:
        # Reductions stay in f32; scale/shift runs in the I/O dtype (bf16/f16
        # VALU on v6e/v7x => half the issue slots per element).
        xn = (diff * inv).astype(o_ref.dtype)
        o_ref[...] = xn * w + b
    else:
        o_ref[...] = ((diff * inv) * w + b).astype(o_ref.dtype)


def layer_norm(x, weight, bias, *, tile_rows=None):
    """LayerNorm over the last axis of x (any leading dims), eps=1e-12."""
    orig_shape = x.shape
    emb_dim = orig_shape[-1]
    rows = 1
    for d in orig_shape[:-1]:
        rows *= d

    # Affine compute dtype: keep bf16/f16 I/O in native precision for the
    # final scale/shift; everything else in f32.
    low_precision_affine = jnp.dtype(x.dtype) in (jnp.dtype(jnp.bfloat16),
                                                  jnp.dtype(jnp.float16))
    affine_dtype = x.dtype if low_precision_affine else jnp.float32

    x2 = x.reshape(rows, emb_dim)
    w2 = weight.reshape(1, emb_dim).astype(affine_dtype)
    b2 = bias.reshape(1, emb_dim).astype(affine_dtype)

    # Lane-dense guard: pad the normalized axis to a multiple of 128 so every
    # store is an unmasked vst; masked statistics keep the math exact.
    emb_pad = _round_up(emb_dim, 128)
    needs_mask = emb_pad != emb_dim
    if needs_mask:
        x2 = jnp.pad(x2, ((0, 0), (0, emb_pad - emb_dim)))
        w2 = jnp.pad(w2, ((0, 0), (0, emb_pad - emb_dim)))
        b2 = jnp.pad(b2, ((0, 0), (0, emb_pad - emb_dim)))

    vmem_limit, budget = _vmem_limits()
    if tile_rows is None:
        tile_rows = _pick_tile_rows(rows, emb_pad, x.dtype, budget)

    grid = (pl.cdiv(rows, tile_rows),)  # ragged final row-tile handled by Pallas

    itemsize = jnp.dtype(x.dtype).itemsize
    cost = pl.CostEstimate(
        flops=8 * rows * emb_pad,
        transcendentals=rows,
        bytes_accessed=2 * rows * emb_pad * itemsize
        + 2 * emb_pad * jnp.dtype(affine_dtype).itemsize,
    )

    kernel = functools.partial(
        _layernorm_kernel,
        emb_dim=emb_dim,
        needs_mask=needs_mask,
        low_precision_affine=low_precision_affine,
    )

    out = pl.pallas_call(
        kernel,
        out_shape=jax.ShapeDtypeStruct((rows, emb_pad), x.dtype),
        grid_spec=pltpu.PrefetchScalarGridSpec(
            num_scalar_prefetch=0,
            grid=grid,
            in_specs=[
                pl.BlockSpec((tile_rows, emb_pad), lambda i: (i, 0)),
                pl.BlockSpec((1, emb_pad), lambda i: (0, 0)),
                pl.BlockSpec((1, emb_pad), lambda i: (0, 0)),
            ],
            out_specs=pl.BlockSpec((tile_rows, emb_pad), lambda i: (i, 0)),
        ),
        compiler_params=pltpu.CompilerParams(
            dimension_semantics=("parallel",),
            vmem_limit_bytes=vmem_limit,
        ),
        cost_estimate=cost,
    )(x2, w2, b2)

    if needs_mask:
        out = out[:, :emb_dim]
    return out.reshape(orig_shape)


def layer_norm_ref(x, weight, bias):
    x32 = x.astype(jnp.float32)
    mean = jnp.mean(x32, axis=-1, keepdims=True)
    var = jnp.mean((x32 - mean) ** 2, axis=-1, keepdims=True)
    norm = (x32 - mean) / jnp.sqrt(var + EPS)
    return (weight.astype(jnp.float32) * norm + bias.astype(jnp.float32)).astype(x.dtype)


if __name__ == "__main__":
    key = jax.random.PRNGKey(0)
    batch, seq, emb_dim = 2, 8, 32

    # Non-zero mean data exercises the two-pass variance path.
    x = jax.random.normal(key, (batch, seq, emb_dim), dtype=jnp.float32) * 0.5 + 3.0
    # Parameters matching the nn.Parameter init in __init__:
    weight = jnp.ones((emb_dim,), dtype=jnp.float32)
    bias = jnp.zeros((emb_dim,), dtype=jnp.float32)

    out = layer_norm(x, weight, bias)
    out = jax.block_until_ready(out)

    ref = layer_norm_ref(x, weight, bias)
    assert out.shape == x.shape
    assert jnp.allclose(out, ref, atol=1e-5, rtol=1e-5)

    print("KERNEL_OK")
</pallas_src>

<mosaic_0001>
module attributes {stable_mosaic.version = 11 : i64} {
  func.func @_layernorm_kernel(%arg0: i32, %arg1: memref<16x128xf32, #tpu.memory_space<vmem>>, %arg2: memref<1x128xf32, #tpu.memory_space<vmem>>, %arg3: memref<1x128xf32, #tpu.memory_space<vmem>>, %arg4: memref<16x128xf32, #tpu.memory_space<vmem>>) attributes {dimension_semantics = [#tpu.dimension_semantics<parallel>], iteration_bounds = array<i64: 1>, scalar_prefetch = 0 : i64, scratch_operands = 0 : i64, tpu.core_type = #tpu.core_type<tc>, window_params = [{transform_indices = @transform_0, window_bounds = array<i64: 16, 128>}, {pipeline_mode = #tpu.pipeline_mode<synchronous>, transform_indices = @transform_1, window_bounds = array<i64: 1, 128>}, {pipeline_mode = #tpu.pipeline_mode<synchronous>, transform_indices = @transform_2, window_bounds = array<i64: 1, 128>}, {transform_indices = @transform_3, window_bounds = array<i64: 16, 128>}]} {
    %c0 = arith.constant 0 : index
    %c0_0 = arith.constant 0 : index
    %0 = vector.load %arg1[%c0, %c0_0] : memref<16x128xf32, #tpu.memory_space<vmem>>, vector<16x128xf32>
    %cst = arith.constant dense<0.000000e+00> : vector<16xf32>
    %1 = vector.multi_reduction <add>, %0, %cst [1] : vector<16x128xf32> to vector<16xf32>
    %2 = vector.shape_cast %1 : vector<16xf32> to vector<16x1xf32>
    %cst_1 = arith.constant 3.125000e-02 : f32
    %3 = vector.broadcast %cst_1 : f32 to vector<16x1xf32>
    %4 = arith.mulf %2, %3 : vector<16x1xf32>
    %5 = vector.broadcast %4 : vector<16x1xf32> to vector<16x128xf32>
    %6 = arith.subf %0, %5 : vector<16x128xf32>
    %7 = tpu.iota {dimensions = array<i32: 1>} : vector<1x128xi32>
    %c32_i32 = arith.constant 32 : i32
    %8 = vector.broadcast %c32_i32 : i32 to vector<1x128xi32>
    %9 = arith.cmpi slt, %7, %8 : vector<1x128xi32>
    %cst_2 = arith.constant 0.000000e+00 : f32
    %10 = vector.shape_cast %9 : vector<1x128xi1> to vector<1x128xi1>
    %11 = vector.broadcast %10 : vector<1x128xi1> to vector<16x128xi1>
    %12 = vector.broadcast %cst_2 : f32 to vector<16x128xf32>
    %13 = arith.select %11, %6, %12 : vector<16x128xi1>, vector<16x128xf32>
    %14 = arith.mulf %13, %13 : vector<16x128xf32>
    %cst_3 = arith.constant dense<0.000000e+00> : vector<16xf32>
    %15 = vector.multi_reduction <add>, %14, %cst_3 [1] : vector<16x128xf32> to vector<16xf32>
    %16 = vector.shape_cast %15 : vector<16xf32> to vector<16x1xf32>
    %cst_4 = arith.constant 3.125000e-02 : f32
    %17 = vector.broadcast %cst_4 : f32 to vector<16x1xf32>
    %18 = arith.mulf %16, %17 : vector<16x1xf32>
    %cst_5 = arith.constant 9.99999996E-13 : f32
    %19 = vector.broadcast %cst_5 : f32 to vector<16x1xf32>
    %20 = arith.addf %18, %19 : vector<16x1xf32>
    %21 = math.rsqrt %20 : vector<16x1xf32>
    %c0_6 = arith.constant 0 : index
    %c0_7 = arith.constant 0 : index
    %22 = vector.load %arg2[%c0_6, %c0_7] : memref<1x128xf32, #tpu.memory_space<vmem>>, vector<1x128xf32>
    %c0_8 = arith.constant 0 : index
    %c0_9 = arith.constant 0 : index
    %23 = vector.load %arg3[%c0_8, %c0_9] : memref<1x128xf32, #tpu.memory_space<vmem>>, vector<1x128xf32>
    %24 = vector.broadcast %21 : vector<16x1xf32> to vector<16x128xf32>
    %25 = arith.mulf %13, %24 : vector<16x128xf32>
    %26 = vector.broadcast %22 : vector<1x128xf32> to vector<16x128xf32>
    %27 = arith.mulf %25, %26 : vector<16x128xf32>
    %28 = vector.broadcast %23 : vector<1x128xf32> to vector<16x128xf32>
    %29 = arith.addf %27, %28 : vector<16x128xf32>
    %c0_10 = arith.constant 0 : index
    %c0_11 = arith.constant 0 : index
    %30 = vector.load %arg4[%c0_10, %c0_11] : memref<16x128xf32, #tpu.memory_space<vmem>>, vector<16x128xf32>
    tpu.vector_store %arg4[%c0_10, %c0_11], %29 {strides = array<i32>} : memref<16x128xf32, #tpu.memory_space<vmem>>, vector<16x128xf32>,
    return
  }
  func.func @transform_0(%arg0: i32) -> (i32, i32) {
    %c0_i32 = arith.constant 0 : i32
    %c0_i32_0 = arith.constant 0 : i32
    return %arg0, %c0_i32 : i32, i32
  }
  func.func @transform_1(%arg0: i32) -> (i32, i32) {
    %c0_i32 = arith.constant 0 : i32
    %c0_i32_0 = arith.constant 0 : i32
    %c0_i32_1 = arith.constant 0 : i32
    return %c0_i32, %c0_i32_0 : i32, i32
  }
  func.func @transform_2(%arg0: i32) -> (i32, i32) {
    %c0_i32 = arith.constant 0 : i32
    %c0_i32_0 = arith.constant 0 : i32
    %c0_i32_1 = arith.constant 0 : i32
    return %c0_i32, %c0_i32_0 : i32, i32
  }
  func.func @transform_3(%arg0: i32) -> (i32, i32) {
    %c0_i32 = arith.constant 0 : i32
    %c0_i32_0 = arith.constant 0 : i32
    return %arg0, %c0_i32 : i32, i32
  }
}

</mosaic_0001>

<bundles_post_ra>
// kernel: tpu_custom_call.1
= control target key start
LH: loop header
LB: loop body
LE: loop exit
PB: predicated region body
PF: predicated region fallthrough
CT: control target
= control target key end

     0   :  { %8 = vsyncpa [#allocation3], 0  ;;  %s260_s0 = inlined_call_operand.hbm [shape: f32[16,128], index: 0, kind: input, shape index: {}]   ;;  %s261_s1 = inlined_call_operand.hbm [shape: f32[1,128], index: 1, kind: input, shape index: {}]   ;;  %s262_s2 = inlined_call_operand.vmem [shape: f32[1,128], index: 2, kind: input, shape index: {}]   ;;  %s263_s3 = inlined_call_operand.hbm [shape: f32[16,128], index: 3, kind: output, shape index: {}]  }
   0x1   :  { %9 = vsyncpa [#allocation6], 0 }
   0x2   :  { %10 = vsyncpa [#allocation4], 0  ;;  %s15_s14 = sshll.u32 %s260_s0, 4  ;;  %s217_s15 = smov [#allocation2]   ;;  %s16_s14 = int_to_ptr.hbm [resolvable:$true] %s15_s14 }
   0x3   :  { %s17_s16 = sshll.u32 %s217_s15, 4  ;;  %s29_s19 = sshll.u32 %s261_s1, 4  ;;  %s18_s16 = int_to_ptr.vmem [resolvable:$true] %s17_s16  ;;  %s30_s19 = int_to_ptr.hbm [resolvable:$true] %s29_s19 }
   0x4   :  { %s218_s20 = smov 128   ;;  %s219_s21 = smov 8  }
   0x5   :  { %23 = dma.hbm_to_vmem [thread:$0]  %s16_s14, 256, %s18_s16, [#allocation3], %s218_s20, %s218_s20, %s219_s21  }
   0x6   :  { %s220_s22 = smov [#allocation5]  }
   0x7   :  { %s31_s23 = sshll.u32 %s220_s22, 4  ;;  %s32_s23 = int_to_ptr.vmem [resolvable:$true] %s31_s23 }
   0x8   :  { %34 = dma.hbm_to_vmem [thread:$0]  %s30_s19, 16, %s32_s23, [#allocation6]  }
   0x9   :  { %211 = dma.done.wait [#allocation3], 256  }
   0xa   :  { %212 = vsyncadd [#allocation3], 4294967040 }
   0xb   :  { %213 = dma.done.wait [#allocation6], 16  }
   0xc   :  { %214 = vsyncadd [#allocation6], 4294967280  ;;  %v45_v0 = vld [vmem:[#allocation2] sm:$0xff]  ;;  %v46_v1 = vld [vmem:[#allocation2 + $0x8] sm:$0xff]  ;;  %v55_v2 = vlaneseq  ;;  %s221_s24 = smov [#allocation7]   ;;  %s114_s28 = sshll.u32 %s263_s3, 4  ;;  %s115_s28 = int_to_ptr.hbm [resolvable:$true] %s114_s28 }
   0xd   :  { %47 = vadd.xlane.f32.xlu0 %v45_v0  ;;  %v133_v28 = vld [vmem:[#allocation5] ss:$0 sm:$0xff]  ;;  %v134_v32 = vld [vmem:[%s262_s2] ss:$0 sm:$0xff]  ;;  %s112_s25 = sshll.u32 %s221_s24, 4  ;;  %s113_s25 = int_to_ptr.vmem [resolvable:$true] %s112_s25 }
   0xe   :  { %v56_v3 = vand.u32 127, %v55_v2 }
  0x10   :  { %vm57_vm0 = vcmp.lt.s32.totalorder %v56_v3, 32 }
  0x15   :  { %49 = vadd.xlane.f32.xlu0 %v46_v1 }
  0x80   :  { %v48_v4 = vpop.xlane.xlu0 %47 }
  0x81   :  { %v51_v5 = vmul.f32 0.03125, %v48_v4 }
  0x83   :  { %v53_v6 = vsub.f32 %v45_v0, %v51_v5 }
  0x85   :  { %v60_v7 = vsel %vm57_vm0, %v53_v6, 0.0 }
  0x86   :  { %v62_v8 = vmul.f32 %v60_v7, %v60_v7 }
  0x88   :  { %64 = vadd.xlane.f32.xlu1 %v62_v8  ;;  %v50_v9 = vpop.xlane.xlu0 %49 }
  0x89   :  { %v52_v10 = vmul.f32 0.03125, %v50_v9 }
  0x8b   :  { %v54_v11 = vsub.f32 %v46_v1, %v52_v10 }
  0x8d   :  { %v61_v12 = vsel %vm57_vm0, %v54_v11, 0.0 }
  0x8e   :  { %v63_v13 = vmul.f32 %v61_v12, %v61_v12 }
  0x90   :  { %66 = vadd.xlane.f32.xlu1 %v63_v13 }
  0xfb   :  { %v65_v14 = vpop.xlane.xlu1 %64 }
  0xfc   :  { %v68_v15 = vmul.f32 0.03125, %v65_v14 }
  0xfe   :  { %v70_v16 = vadd.f32 1e-12, %v68_v15 }
 0x100   :  { %135 = vrsqrt.f32 %v70_v16  ;;  %vm78_vm2 = vweird.f32 %v70_v16 }
 0x103   :  { %v67_v17 = vpop.xlane.xlu1 %66 }
 0x104   :  { %v69_v18 = vmul.f32 0.03125, %v67_v17 }
 0x106   :  { %v136_v19 = vpop.eup %135  ;;  %v71_v20 = vadd.f32 1e-12, %v69_v18 }
 0x107   :  { %v73_v21 = vmul.f32 %v136_v19, %v70_v16  ;;  %vm79_vm1 = vweird.f32 %v136_v19 }
 0x108   :  { %137 = vrsqrt.f32 %v71_v20  ;;  %vm80_vm3 = vmor %vm78_vm2, %vm79_vm1  ;;  %vm88_vm5 = vweird.f32 %v71_v20 }
 0x109   :  { %v74_v22 = vmul.f32 %v136_v19, %v73_v21 }
 0x10b   :  { %v75_v23 = vmul.f32 0.5, %v74_v22 }
 0x10d   :  { %v76_v24 = vsub.f32 1.5, %v75_v23 }
 0x10e   :  { %v138_v25 = vpop.eup %137 }
 0x10f   :  { %v77_v26 = vmul.f32 %v136_v19, %v76_v24  ;;  %v83_v27 = vmul.f32 %v138_v25, %v71_v20  ;;  %vm89_vm4 = vweird.f32 %v138_v25 }
 0x110   :  { %vm90_vm6 = vmor %vm88_vm5, %vm89_vm4 }
 0x111   :  { %v81_v29 = vsel %vm80_vm3, %v136_v19, %v77_v26  ;;  %v84_v30 = vmul.f32 %v138_v25, %v83_v27 }
 0x112   :  { %v94_v31 = vmul.f32 %v81_v29, %v60_v7 }
 0x113   :  { %v85_v33 = vmul.f32 0.5, %v84_v30 }
 0x114   :  { %v99_v34 = vmul.f32 %v133_v28, %v94_v31 }
 0x115   :  { %v86_v35 = vsub.f32 1.5, %v85_v33 }
 0x116   :  { %v104_v36 = vadd.f32 %v134_v32, %v99_v34 }
 0x117   :  { %v87_v37 = vmul.f32 %v138_v25, %v86_v35 }
 0x118   :  { %106 = vst [vmem:[#allocation7] sm:$0xff] %v104_v36 }
 0x119   :  { %v91_v38 = vsel %vm90_vm6, %v138_v25, %v87_v37 }
 0x11a   :  { %v95_v39 = vmul.f32 %v91_v38, %v61_v12 }
 0x11c   :  { %v100_v40 = vmul.f32 %v133_v28, %v95_v39 }
 0x11e   :  { %v105_v41 = vadd.f32 %v134_v32, %v100_v40 }
 0x120   :  { %107 = vst [vmem:[#allocation7 + $0x8] sm:$0xff] %v105_v41 }
 0x121   :  { %120 = dma.vmem_to_hbm [thread:$0]  %s113_s25, 256, %s115_s28, [#allocation4], %s218_s20, %s218_s20, %s219_s21  }
 0x122   :  { %215 = dma.done.wait [#allocation4], 256  }
 0x123   :  { %216 = vsyncadd [#allocation4], 4294967040 }
 0x124   :  { %125 = vsyncpa [#allocation3], 1 }
 0x125   :  { %126 = vsyncpa [#allocation6], 1 }
 0x126   :  { %127 = vsyncpa [#allocation4], 1 }

</bundles_post_ra>
